<compile_context>
chip_gen: v5e
topology: v5e:2x2
jax: 0.10.0
libtpu: 0.0.40
codegen_flags: <defaults>
</compile_context>

<pallas_src>
import jax
import jax.numpy as jnp
from jax import lax
from jax.experimental import pallas as pl
from jax.experimental.pallas import tpu as pltpu


def _head_kernel(x_ref, w1_ref, b1_ref, w2_ref, b2_ref, o_ref):
    # x: [tb, H] CLS rows (dropout == identity in eval mode)
    x = x_ref[...]

    # dense: x @ W1^T + b1  (W1 is torch [out, in] -> contract on dim 1)
    h = lax.dot_general(
        x, w1_ref[...],
        dimension_numbers=(((1,), (1,)), ((), ())),
        preferred_element_type=jnp.float32,
    )
    h = jnp.tanh(h + b1_ref[...])

    # out_proj: h @ W2_pad^T + b2_pad  (lane-dense padded labels)
    out = lax.dot_general(
        h.astype(w2_ref.dtype), w2_ref[...],
        dimension_numbers=(((1,), (1,)), ((), ())),
        preferred_element_type=jnp.float32,
    ) + b2_ref[...]

    o_ref[...] = out.astype(o_ref.dtype)


def roberta_classification_head(features, dense_w, dense_b, out_w, out_b,
                                *, block_b=256):
    """features: [B, S, H]; dense_w: [H, H] (torch [out,in]); dense_b: [H];
    out_w: [L, H] (torch [out,in]); out_b: [L].  Returns [B, L]."""
    B, S, H = features.shape
    L = out_w.shape[0]

    # Take only the CLS token before the kernel: B*H bytes instead of B*S*H.
    x = features[:, 0, :]                                   # [B, H]

    # Lane-dense label padding (zero rows of W2 / zeros of b2 are free on MXU).
    Lp = pl.cdiv(L, 128) * 128
    w2 = jnp.pad(out_w, ((0, Lp - L), (0, 0)))              # [Lp, H]
    b2 = jnp.pad(out_b, ((0, Lp - L),)).reshape(1, Lp)      # [1, Lp]
    b1 = dense_b.reshape(1, H)                              # [1, H]

    tb = min(B, block_b)
    grid = (pl.cdiv(B, tb),)

    itemsize = jnp.dtype(features.dtype).itemsize
    cost = pl.CostEstimate(
        flops=2 * B * H * H + 2 * B * H * Lp,
        transcendentals=B * H,
        bytes_accessed=(B * H + H * H + Lp * H + H + Lp + B * Lp) * itemsize,
    )

    out_padded = pl.pallas_call(
        _head_kernel,
        out_shape=jax.ShapeDtypeStruct((B, Lp), features.dtype),
        grid=grid,
        in_specs=[
            pl.BlockSpec((tb, H), lambda i: (i, 0)),        # x: batch-tiled
            pl.BlockSpec((H, H), lambda i: (0, 0)),         # W1: resident
            pl.BlockSpec((1, H), lambda i: (0, 0)),         # b1: resident
            pl.BlockSpec((Lp, H), lambda i: (0, 0)),        # W2 (padded): resident
            pl.BlockSpec((1, Lp), lambda i: (0, 0)),        # b2 (padded): resident
        ],
        out_specs=pl.BlockSpec((tb, Lp), lambda i: (i, 0)),
        compiler_params=pltpu.CompilerParams(
            dimension_semantics=("parallel",)),
        cost_estimate=cost,
    )(x, dense_w, b1, w2, b2)

    return out_padded[:, :L]


if __name__ == "__main__":
    # Small config: batch=2, seq=8, hidden=32, num_labels=3
    B, S, H, L = 2, 8, 32, 3

    key = jax.random.PRNGKey(0)
    k_feat, k_w1, k_b1, k_w2, k_b2 = jax.random.split(key, 5)

    features = jax.random.normal(k_feat, (B, S, H), dtype=jnp.float32)
    dense_w = jax.random.normal(k_w1, (H, H), dtype=jnp.float32) * 0.02
    dense_b = jax.random.normal(k_b1, (H,), dtype=jnp.float32) * 0.02
    out_w = jax.random.normal(k_w2, (L, H), dtype=jnp.float32) * 0.02
    out_b = jax.random.normal(k_b2, (L,), dtype=jnp.float32) * 0.02

    out = roberta_classification_head(features, dense_w, dense_b, out_w, out_b)
    out = jax.block_until_ready(out)

    # Reference check in plain JAX (same semantics as the PyTorch forward, eval mode).
    x = features[:, 0, :]
    ref = jnp.tanh(x @ dense_w.T + dense_b) @ out_w.T + out_b
    assert out.shape == (B, L)
    assert jnp.allclose(out, ref, atol=1e-5, rtol=1e-5)

    print("KERNEL_OK")
</pallas_src>

<mosaic_0001>
module attributes {stable_mosaic.version = 11 : i64} {
  func.func @_head_kernel(%arg0: i32, %arg1: memref<2x32xf32, #tpu.memory_space<vmem>>, %arg2: memref<32x32xf32, #tpu.memory_space<vmem>>, %arg3: memref<1x32xf32, #tpu.memory_space<vmem>>, %arg4: memref<128x32xf32, #tpu.memory_space<vmem>>, %arg5: memref<1x128xf32, #tpu.memory_space<vmem>>, %arg6: memref<2x128xf32, #tpu.memory_space<vmem>>) attributes {dimension_semantics = [#tpu.dimension_semantics<parallel>], iteration_bounds = array<i64: 1>, scalar_prefetch = 0 : i64, scratch_operands = 0 : i64, tpu.core_type = #tpu.core_type<tc>, window_params = [{transform_indices = @transform_0, window_bounds = array<i64: 2, 32>}, {pipeline_mode = #tpu.pipeline_mode<synchronous>, transform_indices = @transform_1, window_bounds = array<i64: 32, 32>}, {pipeline_mode = #tpu.pipeline_mode<synchronous>, transform_indices = @transform_2, window_bounds = array<i64: 1, 32>}, {pipeline_mode = #tpu.pipeline_mode<synchronous>, transform_indices = @transform_3, window_bounds = array<i64: 128, 32>}, {pipeline_mode = #tpu.pipeline_mode<synchronous>, transform_indices = @transform_4, window_bounds = array<i64: 1, 128>}, {transform_indices = @transform_5, window_bounds = array<i64: 2, 128>}]} {
    %c0 = arith.constant 0 : index
    %c0_0 = arith.constant 0 : index
    %0 = vector.load %arg1[%c0, %c0_0] : memref<2x32xf32, #tpu.memory_space<vmem>>, vector<2x32xf32>
    %c0_1 = arith.constant 0 : index
    %c0_2 = arith.constant 0 : index
    %1 = vector.load %arg2[%c0_1, %c0_2] : memref<32x32xf32, #tpu.memory_space<vmem>>, vector<32x32xf32>
    %cst = arith.constant dense<0.000000e+00> : vector<2x32xf32>
    %2 = tpu.matmul %0, %1, %cst {dimension_numbers = #tpu.dot_dimension_numbers<[1], [1], [0], [0], [0, 0, 1, 0], [], []>} : vector<2x32xf32>, vector<32x32xf32>, vector<2x32xf32> -> vector<2x32xf32>
    %c0_3 = arith.constant 0 : index
    %c0_4 = arith.constant 0 : index
    %3 = vector.load %arg3[%c0_3, %c0_4] : memref<1x32xf32, #tpu.memory_space<vmem>>, vector<1x32xf32>
    %4 = vector.broadcast %3 : vector<1x32xf32> to vector<2x32xf32>
    %5 = arith.addf %2, %4 : vector<2x32xf32>
    %6 = math.tanh %5 : vector<2x32xf32>
    %c0_5 = arith.constant 0 : index
    %c0_6 = arith.constant 0 : index
    %7 = vector.load %arg4[%c0_5, %c0_6] : memref<128x32xf32, #tpu.memory_space<vmem>>, vector<128x32xf32>
    %cst_7 = arith.constant dense<0.000000e+00> : vector<2x128xf32>
    %8 = tpu.matmul %6, %7, %cst_7 {dimension_numbers = #tpu.dot_dimension_numbers<[1], [1], [0], [0], [0, 0, 1, 0], [], []>} : vector<2x32xf32>, vector<128x32xf32>, vector<2x128xf32> -> vector<2x128xf32>
    %c0_8 = arith.constant 0 : index
    %c0_9 = arith.constant 0 : index
    %9 = vector.load %arg5[%c0_8, %c0_9] : memref<1x128xf32, #tpu.memory_space<vmem>>, vector<1x128xf32>
    %10 = vector.broadcast %9 : vector<1x128xf32> to vector<2x128xf32>
    %11 = arith.addf %8, %10 : vector<2x128xf32>
    %c0_10 = arith.constant 0 : index
    %c0_11 = arith.constant 0 : index
    %12 = vector.load %arg6[%c0_10, %c0_11] : memref<2x128xf32, #tpu.memory_space<vmem>>, vector<2x128xf32>
    tpu.vector_store %arg6[%c0_10, %c0_11], %11 {strides = array<i32>} : memref<2x128xf32, #tpu.memory_space<vmem>>, vector<2x128xf32>,
    return
  }
  func.func @transform_0(%arg0: i32) -> (i32, i32) {
    %c0_i32 = arith.constant 0 : i32
    %c0_i32_0 = arith.constant 0 : i32
    return %arg0, %c0_i32 : i32, i32
  }
  func.func @transform_1(%arg0: i32) -> (i32, i32) {
    %c0_i32 = arith.constant 0 : i32
    %c0_i32_0 = arith.constant 0 : i32
    %c0_i32_1 = arith.constant 0 : i32
    return %c0_i32, %c0_i32_0 : i32, i32
  }
  func.func @transform_2(%arg0: i32) -> (i32, i32) {
    %c0_i32 = arith.constant 0 : i32
    %c0_i32_0 = arith.constant 0 : i32
    %c0_i32_1 = arith.constant 0 : i32
    return %c0_i32, %c0_i32_0 : i32, i32
  }
  func.func @transform_3(%arg0: i32) -> (i32, i32) {
    %c0_i32 = arith.constant 0 : i32
    %c0_i32_0 = arith.constant 0 : i32
    %c0_i32_1 = arith.constant 0 : i32
    return %c0_i32, %c0_i32_0 : i32, i32
  }
  func.func @transform_4(%arg0: i32) -> (i32, i32) {
    %c0_i32 = arith.constant 0 : i32
    %c0_i32_0 = arith.constant 0 : i32
    %c0_i32_1 = arith.constant 0 : i32
    return %c0_i32, %c0_i32_0 : i32, i32
  }
  func.func @transform_5(%arg0: i32) -> (i32, i32) {
    %c0_i32 = arith.constant 0 : i32
    %c0_i32_0 = arith.constant 0 : i32
    return %arg0, %c0_i32 : i32, i32
  }
}

</mosaic_0001>

<bundles_post_ra>
// kernel: tpu_custom_call.1
= control target key start
LH: loop header
LB: loop body
LE: loop exit
PB: predicated region body
PF: predicated region fallthrough
CT: control target
= control target key end

     0   :  { %vm30_vm0 = vcmask 261120   ;;  %s353_s0 = inlined_call_operand.vmem [shape: f32[2,32], index: 0, kind: input, shape index: {}]   ;;  %s354_s1 = inlined_call_operand.vmem [shape: f32[32,32], index: 1, kind: input, shape index: {}]   ;;  %s355_s2 = inlined_call_operand.vmem [shape: f32[1,32], index: 2, kind: input, shape index: {}]   ;;  %s356_s3 = inlined_call_operand.vmem [shape: f32[128,32], index: 3, kind: input, shape index: {}]   ;;  %s357_s4 = inlined_call_operand.vmem [shape: f32[1,128], index: 4, kind: input, shape index: {}]   ;;  %s358_s5 = inlined_call_operand.hbm [shape: f32[2,128], index: 5, kind: output, shape index: {}]  }
   0x1   :  { %v25_v0 = vld [vmem:[%s354_s1 + $0x18] sm:$0xff]  ;;  %v24_v2 = vld [vmem:[%s354_s1 + $0x10] sm:$0xff] }
   0x2   :  { %175 = vmatpush.xpose.msk.msra.mxu0 %vm30_vm0, %v25_v0  ;;  %v82_v1 = vld [vmem:[%s356_s3 + $0x78] sm:$0xff]  ;;  %v81_v3 = vld [vmem:[%s356_s3 + $0x70] sm:$0xff] }
   0x3   :  { %180 = vmatpush.xpose.msk.msra.mxu1 %vm30_vm0, %v82_v1 }
   0x6   :  { %176 = vmatpush.xpose.msk.msra.mxu0 %vm30_vm0, %v24_v2 }
   0x7   :  { %10 = vsyncpa [#allocation3], 0  ;;  %v23_v4 = vld [vmem:[%s354_s1 + $0x8] sm:$0xff]  ;;  %181 = vmatpush.xpose.msk.msra.mxu1 %vm30_vm0, %v81_v3  ;;  %v22_v6 = vld [vmem:[%s354_s1] sm:$0xff]  ;;  %s228_s12 = smov [#allocation2]   ;;  %s166_s14 = sshll.u32 %s358_s5, 4  ;;  %s167_s14 = int_to_ptr.hbm [resolvable:$true] %s166_s14 }
   0x8   :  { %v80_v5 = vld [vmem:[%s356_s3 + $0x68] sm:$0xff]  ;;  %v79_v7 = vld [vmem:[%s356_s3 + $0x60] sm:$0xff]  ;;  %v78_v9 = vld [vmem:[%s356_s3 + $0x58] sm:$0xff]  ;;  %s164_s1 = sshll.u32 %s228_s12, 4  ;;  %s165_s1 = int_to_ptr.vmem [resolvable:$true] %s164_s1 }
   0x9   :  { %v21_v8 = vld [vmem:[%s353_s0] sm:$0x3]  ;;  %v77_v10 = vld [vmem:[%s356_s3 + $0x50] sm:$0xff]  ;;  %v76_v11 = vld [vmem:[%s356_s3 + $0x48] sm:$0xff] }
   0xa   :  { %177 = vmatpush.xpose.msk.msra.mxu0 %vm30_vm0, %v23_v4  ;;  %v75_v12 = vld [vmem:[%s356_s3 + $0x40] sm:$0xff]  ;;  %v74_v13 = vld [vmem:[%s356_s3 + $0x38] sm:$0xff]  ;;  %v73_v14 = vld [vmem:[%s356_s3 + $0x30] sm:$0xff] }
   0xb   :  { %182 = vmatpush.xpose.msk.msra.mxu1 %vm30_vm0, %v80_v5  ;;  %v72_v15 = vld [vmem:[%s356_s3 + $0x28] sm:$0xff]  ;;  %v71_v16 = vld [vmem:[%s356_s3 + $0x20] sm:$0xff]  ;;  %v70_v17 = vld [vmem:[%s356_s3 + $0x18] sm:$0xff] }
   0xc   :  { %v69_v18 = vld [vmem:[%s356_s3 + $0x10] sm:$0xff]  ;;  %v68_v19 = vld [vmem:[%s356_s3 + $0x8] sm:$0xff]  ;;  %v67_v20 = vld [vmem:[%s356_s3] sm:$0xff] }
   0xd   :  { %v198_v21 = vld [vmem:[%s355_s2] ss:$0 sm:$0xff] }
   0xe   :  { %178 = vmatpush.xpose.msk.msra.mxu0 %vm30_vm0, %v22_v6  ;;  %v199_v25 = vld [vmem:[%s357_s4] ss:$0 sm:$0xff] }
   0xf   :  { %183 = vmatpush.xpose.msk.msra.mxu1 %vm30_vm0, %v79_v7 }
  0x11   :  { %179 = vmatmul.msk.f32.vlgmr.msra.gmra.mxu0 %vm30_vm0, %v21_v8 }
  0x13   :  { %184 = vmatpush.xpose.msk.msra.mxu1 %vm30_vm0, %v78_v9 }
  0x17   :  { %185 = vmatpush.xpose.msk.msra.mxu1 %vm30_vm0, %v77_v10 }
  0x1b   :  { %186 = vmatpush.xpose.msk.msra.mxu1 %vm30_vm0, %v76_v11 }
  0x1f   :  { %187 = vmatpush.xpose.msk.msra.mxu1 %vm30_vm0, %v75_v12 }
  0x23   :  { %188 = vmatpush.xpose.msk.msra.mxu1 %vm30_vm0, %v74_v13 }
  0x27   :  { %189 = vmatpush.xpose.msk.msra.mxu1 %vm30_vm0, %v73_v14 }
  0x2b   :  { %190 = vmatpush.xpose.msk.msra.mxu1 %vm30_vm0, %v72_v15 }
  0x2f   :  { %191 = vmatpush.xpose.msk.msra.mxu1 %vm30_vm0, %v71_v16 }
  0x33   :  { %192 = vmatpush.xpose.msk.msra.mxu1 %vm30_vm0, %v70_v17 }
  0x37   :  { %193 = vmatpush.xpose.msk.msra.mxu1 %vm30_vm0, %v69_v18 }
  0x3b   :  { %194 = vmatpush.xpose.msk.msra.mxu1 %vm30_vm0, %v68_v19 }
  0x3f   :  { %195 = vmatpush.xpose.msk.msra.mxu1 %vm30_vm0, %v67_v20 }
  0x8e   :  { %v63_v22 = vpop.f32.mrf.mxu0 }
  0x8f   :  { %v64_v23 = vadd.f32 %v198_v21, %v63_v22 }
  0x91   :  { %200 = vtanh.f32 %v64_v23 }
  0x97   :  { %v201_v24 = vpop.eup %200 }
  0x98   :  { %196 = vmatmul.msk.f32.vlgmr.msra.gmra.mxu1 %vm30_vm0, %v201_v24 }
 0x115   :  { %v155_v26 = vpop.f32.mrf.mxu1 }
 0x116   :  { %v156_v27 = vadd.f32 %v199_v25, %v155_v26 }
 0x118   :  { %158 = vst [vmem:[#allocation2] sm:$0x3] %v156_v27 }
 0x119   :  { %169 = dma.vmem_to_hbm [thread:$0]  %s165_s1, 32, %s167_s14, [#allocation3]  }
 0x11a   :  { %226 = dma.done.wait [#allocation3], 32  }
 0x11b   :  { %227 = vsyncadd [#allocation3], 4294967264 }
 0x11c   :  { %174 = vsyncpa [#allocation3], 1 }

</bundles_post_ra>
